<compile_context>
chip_gen: v6e
topology: v6e:2x2x1
jax: 0.10.0
libtpu: 0.0.40
codegen_flags: <defaults>
</compile_context>

<pallas_src>
import jax
import jax.numpy as jnp
from jax.experimental import pallas as pl
from jax.experimental.pallas import tpu as pltpu


def _per_atom_mse_kernel(inv_b_ref, pred_ref, tgt_ref, n_ref, out_ref):
    """pred/tgt/n: (1, B) f32 VMEM tiles; inv_b: (1,) f32 SMEM scalar.

    diff = (pred - tgt) * (1/n) == pred/n - tgt/n exactly (up to the approx
    reciprocal), so the MSE matches the PyTorch reference.
    """
    pred = pred_ref[...]
    tgt = tgt_ref[...]
    n = n_ref[...]

    # one approx reciprocal (EUP slot) + VPU mul instead of two divides
    diff = (pred - tgt) * pl.reciprocal(n, approx=True)
    sq_sum = jnp.sum(diff * diff)              # VPU mul + XLU reduce

    # scalar result straight to SMEM (no masked VMEM vst / padded writeback)
    out_ref[0, 0] = sq_sum * inv_b_ref[0]


def per_atom_loss(pred_energy: jax.Array,
                  tgt_energy: jax.Array,
                  n_atoms: jax.Array) -> jax.Array:
    """MSE of per-atom (extrinsic -> intrinsic) energies, computed in Pallas."""
    assert pred_energy.shape == tgt_energy.shape == n_atoms.shape
    b = pred_energy.shape[0]

    # Free reshapes / dtype no-ops only -- no padding, no stacking fusion.
    pred = pred_energy.astype(jnp.float32).reshape(1, b)
    tgt = tgt_energy.astype(jnp.float32).reshape(1, b)
    n = n_atoms.astype(jnp.float32).reshape(1, b)
    inv_b = jnp.full((1,), 1.0 / b, dtype=jnp.float32)   # SMEM scalar, not a closure

    out = pl.pallas_call(
        _per_atom_mse_kernel,
        out_shape=jax.ShapeDtypeStruct((1, 1), jnp.float32),
        in_specs=[
            pl.BlockSpec(memory_space=pltpu.MemorySpace.SMEM),   # inv_b
            pl.BlockSpec(memory_space=pltpu.MemorySpace.VMEM),   # pred
            pl.BlockSpec(memory_space=pltpu.MemorySpace.VMEM),   # tgt
            pl.BlockSpec(memory_space=pltpu.MemorySpace.VMEM),   # n_atoms
        ],
        out_specs=pl.BlockSpec(memory_space=pltpu.MemorySpace.SMEM),
        cost_estimate=pl.CostEstimate(
            flops=5 * b, transcendentals=b, bytes_accessed=12 * b + 8),
    )(inv_b, pred, tgt, n)
    return out[0, 0]


if __name__ == "__main__":
    key = jax.random.PRNGKey(0)
    k1, k2, k3 = jax.random.split(key, 3)

    batch = 8  # batched systems
    # predicted & target total energies (extrinsic, scale ~ n_atoms)
    pred_energy = jax.random.normal(k1, (batch,), dtype=jnp.float32) * 50.0
    tgt_energy = jax.random.normal(k2, (batch,), dtype=jnp.float32) * 50.0
    # system sizes (number of atoms per batched system)
    n_atoms = jax.random.randint(k3, (batch,), 4, 64).astype(jnp.float32)

    loss = per_atom_loss(pred_energy, tgt_energy, n_atoms)
    jax.block_until_ready(loss)

    # reference check in plain JAX (MSELoss default reduction='mean');
    # tolerance loosened for the approx reciprocal (~1e-3 relative error).
    ref = jnp.mean((pred_energy / n_atoms - tgt_energy / n_atoms) ** 2)
    assert jnp.allclose(loss, ref, rtol=5e-3, atol=1e-6), (loss, ref)

    print("KERNEL_OK")
</pallas_src>

<mosaic_0001>
module attributes {stable_mosaic.version = 11 : i64} {
  func.func @_per_atom_mse_kernel(%arg0: memref<1xf32, #tpu.memory_space<smem>>, %arg1: memref<1x8xf32, #tpu.memory_space<vmem>>, %arg2: memref<1x8xf32, #tpu.memory_space<vmem>>, %arg3: memref<1x8xf32, #tpu.memory_space<vmem>>, %arg4: memref<1x1xf32, #tpu.memory_space<smem>>) attributes {dimension_semantics = [], scalar_prefetch = 0 : i64, scratch_operands = 0 : i64, tpu.core_type = #tpu.core_type<tc>} {
    %c0 = arith.constant 0 : index
    %c0_0 = arith.constant 0 : index
    %0 = vector.load %arg1[%c0, %c0_0] : memref<1x8xf32, #tpu.memory_space<vmem>>, vector<1x8xf32>
    %c0_1 = arith.constant 0 : index
    %c0_2 = arith.constant 0 : index
    %1 = vector.load %arg2[%c0_1, %c0_2] : memref<1x8xf32, #tpu.memory_space<vmem>>, vector<1x8xf32>
    %c0_3 = arith.constant 0 : index
    %c0_4 = arith.constant 0 : index
    %2 = vector.load %arg3[%c0_3, %c0_4] : memref<1x8xf32, #tpu.memory_space<vmem>>, vector<1x8xf32>
    %3 = arith.subf %0, %1 : vector<1x8xf32>
    %4 = tpu.reciprocal %2 {approx = true} : vector<1x8xf32> -> vector<1x8xf32>
    %5 = arith.mulf %3, %4 : vector<1x8xf32>
    %6 = arith.mulf %5, %5 : vector<1x8xf32>
    %7 = vector.shape_cast %6 : vector<1x8xf32> to vector<1x1x8xf32>
    %cst = arith.constant dense<0.000000e+00> : vector<1xf32>
    %8 = vector.multi_reduction <add>, %7, %cst [1, 2] : vector<1x1x8xf32> to vector<1xf32>
    %9 = vector.shape_cast %8 : vector<1xf32> to vector<1x1x1xf32>
    %10 = vector.extract %9[0, 0, 0] : f32 from vector<1x1x1xf32>
    %c0_5 = arith.constant 0 : index
    %11 = memref.load %arg0[%c0_5] : memref<1xf32, #tpu.memory_space<smem>>
    %12 = arith.mulf %10, %11 : f32
    %c0_6 = arith.constant 0 : index
    %c0_7 = arith.constant 0 : index
    %13 = memref.load %arg4[%c0_6, %c0_7] : memref<1x1xf32, #tpu.memory_space<smem>>
    memref.store %12, %arg4[%c0_6, %c0_7] : memref<1x1xf32, #tpu.memory_space<smem>>
    return
  }
}

</mosaic_0001>

<bundles_post_ra>
// kernel: tpu_custom_call.1
= control target key start
LH: loop header
LB: loop body
LE: loop exit
PB: predicated region body
PF: predicated region fallthrough
CT: control target
= control target key end

     0   :  { %s110_s0 = inlined_call_operand.<no memory space> [shape: f32[1], index: 0, kind: input, shape index: {}]   ;;  %s111_s1 = inlined_call_operand.vmem [shape: f32[1,8], index: 1, kind: input, shape index: {}]   ;;  %s112_s2 = inlined_call_operand.vmem [shape: f32[1,8], index: 2, kind: input, shape index: {}]   ;;  %s113_s3 = inlined_call_operand.vmem [shape: f32[1,8], index: 3, kind: input, shape index: {}]   ;;  %s114_s4 = inlined_call_operand.hbm [shape: f32[1,1], index: 4, kind: output, shape index: {}]  }
   0x1   :  { %v21_v0 = vld [vmem:[%s113_s3] sm:$0x1] }
   0x2   :  { %57 = vrcp.f32 %v21_v0 }
   0x3   :  { %10 = vsyncpa [#allocation4], 0  ;;  %v19_v1 = vld [vmem:[%s111_s1] sm:$0x1]  ;;  %vm26_vm0 = vcmask 57344   ;;  %s69_s22 = smov [#allocation3]  }
   0x4   :  { %v20_v2 = vld [vmem:[%s112_s2] sm:$0x1] }
   0x5   :  { %v22_v3 = vsub.f32 %v19_v1, %v20_v2 }
   0xf   :  { %v58_v4 = vpop.eup %57 }
  0x10   :  { %v24_v5 = vmul.f32 %v58_v4, %v22_v3 }
  0x12   :  { %v25_v6 = vmul.f32 %v24_v5, %v24_v5 }
  0x14   :  { %v27_v7 = vsel %vm26_vm0, %v25_v6, 0.0 }
  0x15   :  { %28 = vadd.xlane.f32.xlu0 %v27_v7 }
  0x9e   :  { %v29_v8 = vpop.xlane.xlu0 %28 }
  0x9f   :  { %v30_v9 = vrot.slane %v29_v8, 4 }
  0xa1   :  { %v31_v10 = vadd.f32 %v30_v9, %v29_v8 }
  0xa3   :  { %v32_v11 = vrot.slane %v31_v10, 2 }
  0xa5   :  { %v33_v12 = vadd.f32 %v32_v11, %v31_v10 }
  0xa7   :  { %v34_v13 = vrot.slane %v33_v12, 1 }
  0xa9   :  { %v35_v14 = vadd.f32 %v34_v13, %v33_v12 }
  0xab   :  { %54 = vpush %v35_v14 }
  0xdc   :  { %s55_s1 = spop %54 }
  0xdd   :  { %s38_s2 = smul.f32 %s55_s1, %s110_s0 }
  0xdf   :  { %40 = sst [smem:[#allocation3]] %s38_s2 }
  0xe0   :  { %48 = dma.smem_to_hbm %s69_s22, 16, %s114_s4, [#allocation4]  }
  0xe1   :  { %67 = dma.done.wait [#allocation4], 16  }
  0xe2   :  { %68 = vsyncadd [#allocation4], 4294967280 }
  0xe3   :  { %52 = sfence }
  0xe4   :  { %53 = vsyncpa [#allocation4], 1 }

</bundles_post_ra>
